<compile_context>
chip_gen: v7x
topology: tpu7x:2x2x1
jax: 0.10.0
libtpu: 0.0.40
codegen_flags: <defaults>
</compile_context>

<pallas_src>
import math
import jax
import jax.numpy as jnp
from jax.experimental import pallas as pl
from jax.experimental.pallas import tpu as pltpu

_LANE = 128      # lane width of a vreg
_SUBLANE = 16    # bf16-safe sublane multiple (also fine for f32)


def _round_up(x, m):
    return (x + m - 1) // m * m


def _sine_layer_kernel(x_ref, w_ref, b_ref, o_ref):
    # MXU matmul with f32 accumulation; bias add + sin in f32; cast on store.
    z = jnp.dot(x_ref[...], w_ref[...], preferred_element_type=jnp.float32)
    z = z + b_ref[...]                       # (tm, Np) + (1, Np) broadcast, f32
    o_ref[...] = jnp.sin(z).astype(o_ref.dtype)


def prep_sine_layer_params(weight, bias, omega_0=30.0,
                           compute_dtype=jnp.bfloat16):
    """One-time parameter prep (do NOT call per forward pass in real use).

    Folds omega_0 into the weights/bias, transposes the weight to (K, N), and
    pads the output dimension up to a multiple of 128 lanes so the kernel's
    stores are lane-dense.  Returns (w_t_padded, b_padded, out_features).
    """
    N, K = weight.shape
    n_pad = _round_up(max(N, _LANE), _LANE)
    w_t = (omega_0 * weight.T).astype(compute_dtype)        # (K, N)
    w_t = jnp.pad(w_t, ((0, 0), (0, n_pad - N)))
    b = (omega_0 * bias).astype(jnp.float32).reshape(1, N)  # keep bias in f32
    b = jnp.pad(b, ((0, 0), (0, n_pad - N)))
    return w_t, b, N


def sine_layer_apply(x, w_t, b, n_out, *, tm=512, out_dtype=None):
    """x: (..., K); w_t: (K, Np) pre-scaled/padded; b: (1, Np); returns (..., n_out)."""
    orig_shape = x.shape
    K = orig_shape[-1]
    Kw, Np = w_t.shape
    assert K == Kw, "in_features mismatch between x and prepped weight"
    if out_dtype is None:
        out_dtype = x.dtype
    compute_dtype = w_t.dtype

    x2 = x.reshape(-1, K).astype(compute_dtype)
    B = x2.shape[0]

    in_b = jnp.dtype(compute_dtype).itemsize
    out_b = jnp.dtype(out_dtype).itemsize

    # Pick the largest batch tile that fits a conservative, portable VMEM
    # budget (double-buffered x/out tiles + resident weight/bias).
    tm = max(_SUBLANE, min(int(tm), _round_up(B, _SUBLANE)))
    tm = _round_up(tm, _SUBLANE)

    def footprint(t):
        return (2 * t * (K * in_b + Np * out_b)          # double-buffered x + out
                + 2 * (K * Np * in_b + Np * 4))          # weight + bias buffers

    vmem_budget = 40 * 1024 * 1024                       # safe incl. v7x (64 MiB VMEM)
    while tm > _SUBLANE and footprint(tm) > vmem_budget:
        tm = _round_up(max(_SUBLANE, tm // 2), _SUBLANE)

    # Pad batch to a multiple of tm instead of asserting divisibility.
    B_pad = _round_up(B, tm)
    if B_pad != B:
        x2 = jnp.pad(x2, ((0, B_pad - B), (0, 0)))

    grid = (B_pad // tm,)

    cost = pl.CostEstimate(
        flops=2 * B_pad * K * Np,
        transcendentals=B_pad * Np,
        bytes_accessed=B_pad * K * in_b + K * Np * in_b + Np * 4
                       + B_pad * Np * out_b,
    )

    vmem_limit = int(min(48 * 1024 * 1024,
                         max(32 * 1024 * 1024,
                             footprint(tm) * 5 // 4 + (2 << 20))))

    out = pl.pallas_call(
        _sine_layer_kernel,
        out_shape=jax.ShapeDtypeStruct((B_pad, Np), out_dtype),
        grid_spec=pltpu.PrefetchScalarGridSpec(
            num_scalar_prefetch=0,
            grid=grid,
            in_specs=[
                pl.BlockSpec((tm, K), lambda i: (i, 0)),   # x batch tile
                pl.BlockSpec((K, Np), lambda i: (0, 0)),   # full weight (resident)
                pl.BlockSpec((1, Np), lambda i: (0, 0)),   # bias (resident)
            ],
            out_specs=pl.BlockSpec((tm, Np), lambda i: (i, 0)),
        ),
        compiler_params=pltpu.CompilerParams(
            dimension_semantics=("parallel",),
            vmem_limit_bytes=vmem_limit),
        cost_estimate=cost,
    )(x2, w_t, b)

    out = out[:B, :n_out]
    return out.reshape(*orig_shape[:-1], n_out)


def sine_layer(x, weight, bias, omega_0=30.0, *, tm=512,
               compute_dtype=jnp.bfloat16, out_dtype=None):
    """Convenience wrapper matching the PyTorch forward:
         y = sin(omega_0 * (x @ W^T + b))
    In a real network, call prep_sine_layer_params once and reuse the result.
    """
    w_t, b, n_out = prep_sine_layer_params(weight, bias, omega_0, compute_dtype)
    return sine_layer_apply(x, w_t, b, n_out, tm=tm,
                            out_dtype=out_dtype if out_dtype is not None else x.dtype)


def init_sine_layer_params(key, in_features, out_features, is_first=False,
                           omega_0=30.0, dtype=jnp.float32):
    """Deterministic SIREN init matching the PyTorch module."""
    kw, kb = jax.random.split(key)
    if is_first:
        bound_w = 1.0 / in_features
    else:
        bound_w = math.sqrt(6.0 / in_features) / omega_0
    weight = jax.random.uniform(kw, (out_features, in_features),
                                minval=-bound_w, maxval=bound_w, dtype=dtype)
    # nn.Linear default bias init: U(-1/sqrt(in_features), 1/sqrt(in_features))
    bound_b = 1.0 / math.sqrt(in_features)
    bias = jax.random.uniform(kb, (out_features,),
                              minval=-bound_b, maxval=bound_b, dtype=dtype)
    return weight, bias


if __name__ == "__main__":
    key = jax.random.PRNGKey(0)
    k_x, k_p = jax.random.split(key)

    batch, in_features, out_features = 16, 64, 32
    omega_0 = 30.0
    is_first = True

    x = jax.random.normal(k_x, (batch, in_features), dtype=jnp.float32)
    weight, bias = init_sine_layer_params(k_p, in_features, out_features,
                                          is_first=is_first, omega_0=omega_0)

    # plain-JAX reference
    y_ref = jnp.sin(omega_0 * (x @ weight.T + bias))

    # f32 path: strict correctness check
    y_f32 = sine_layer(x, weight, bias, omega_0=omega_0,
                       compute_dtype=jnp.float32)
    jax.block_until_ready(y_f32)
    assert y_f32.shape == (batch, out_features)
    assert jnp.allclose(y_f32, y_ref, atol=1e-5, rtol=1e-5)

    # bf16 fast path (default): looser tolerance for reduced input precision
    y_bf16 = sine_layer(x, weight, bias, omega_0=omega_0,
                        compute_dtype=jnp.bfloat16)
    jax.block_until_ready(y_bf16)
    assert y_bf16.shape == (batch, out_features)
    assert jnp.allclose(y_bf16, y_ref, atol=5e-2, rtol=5e-2)

    print("KERNEL_OK")
</pallas_src>

<mosaic_0001>
module attributes {stable_mosaic.version = 11 : i64} {
  func.func @_sine_layer_kernel(%arg0: i32, %arg1: memref<16x64xf32, #tpu.memory_space<vmem>>, %arg2: memref<64x128xf32, #tpu.memory_space<vmem>>, %arg3: memref<1x128xf32, #tpu.memory_space<vmem>>, %arg4: memref<16x128xf32, #tpu.memory_space<vmem>>) attributes {dimension_semantics = [#tpu.dimension_semantics<parallel>], iteration_bounds = array<i64: 1>, scalar_prefetch = 0 : i64, scratch_operands = 0 : i64, tpu.core_type = #tpu.core_type<tc>, window_params = [{transform_indices = @transform_0, window_bounds = array<i64: 16, 64>}, {pipeline_mode = #tpu.pipeline_mode<synchronous>, transform_indices = @transform_1, window_bounds = array<i64: 64, 128>}, {pipeline_mode = #tpu.pipeline_mode<synchronous>, transform_indices = @transform_2, window_bounds = array<i64: 1, 128>}, {transform_indices = @transform_3, window_bounds = array<i64: 16, 128>}]} {
    %c0 = arith.constant 0 : index
    %c0_0 = arith.constant 0 : index
    %0 = vector.load %arg1[%c0, %c0_0] : memref<16x64xf32, #tpu.memory_space<vmem>>, vector<16x64xf32>
    %c0_1 = arith.constant 0 : index
    %c0_2 = arith.constant 0 : index
    %1 = vector.load %arg2[%c0_1, %c0_2] : memref<64x128xf32, #tpu.memory_space<vmem>>, vector<64x128xf32>
    %cst = arith.constant dense<0.000000e+00> : vector<16x128xf32>
    %2 = tpu.matmul %0, %1, %cst {dimension_numbers = #tpu.dot_dimension_numbers<[1], [0], [0], [1], [0, 0, 1, 1], [], []>} : vector<16x64xf32>, vector<64x128xf32>, vector<16x128xf32> -> vector<16x128xf32>
    %c0_3 = arith.constant 0 : index
    %c0_4 = arith.constant 0 : index
    %3 = vector.load %arg3[%c0_3, %c0_4] : memref<1x128xf32, #tpu.memory_space<vmem>>, vector<1x128xf32>
    %4 = vector.broadcast %3 : vector<1x128xf32> to vector<16x128xf32>
    %5 = arith.addf %2, %4 : vector<16x128xf32>
    %6 = math.sin %5 : vector<16x128xf32>
    %c0_5 = arith.constant 0 : index
    %c0_6 = arith.constant 0 : index
    %7 = vector.load %arg4[%c0_5, %c0_6] : memref<16x128xf32, #tpu.memory_space<vmem>>, vector<16x128xf32>
    tpu.vector_store %arg4[%c0_5, %c0_6], %6 {strides = array<i32>} : memref<16x128xf32, #tpu.memory_space<vmem>>, vector<16x128xf32>,
    return
  }
  func.func @transform_0(%arg0: i32) -> (i32, i32) {
    %c0_i32 = arith.constant 0 : i32
    %c0_i32_0 = arith.constant 0 : i32
    return %arg0, %c0_i32 : i32, i32
  }
  func.func @transform_1(%arg0: i32) -> (i32, i32) {
    %c0_i32 = arith.constant 0 : i32
    %c0_i32_0 = arith.constant 0 : i32
    %c0_i32_1 = arith.constant 0 : i32
    return %c0_i32, %c0_i32_0 : i32, i32
  }
  func.func @transform_2(%arg0: i32) -> (i32, i32) {
    %c0_i32 = arith.constant 0 : i32
    %c0_i32_0 = arith.constant 0 : i32
    %c0_i32_1 = arith.constant 0 : i32
    return %c0_i32, %c0_i32_0 : i32, i32
  }
  func.func @transform_3(%arg0: i32) -> (i32, i32) {
    %c0_i32 = arith.constant 0 : i32
    %c0_i32_0 = arith.constant 0 : i32
    return %arg0, %c0_i32 : i32, i32
  }
}

</mosaic_0001>

<bundles_post_ra>
// kernel: tpu_custom_call.1
= control target key start
LH: loop header
LB: loop body
LE: loop exit
PB: predicated region body
PF: predicated region fallthrough
CT: control target
= control target key end

     0   :  { %8 = vsyncpa [#allocation3], 0  ;;  %s668_s0 = inlined_call_operand.hbm [shape: f32[16,64], index: 0, kind: input, shape index: {}]   ;;  %s669_s1 = inlined_call_operand.hbm [shape: f32[64,128], index: 1, kind: input, shape index: {}]   ;;  %s670_s2 = inlined_call_operand.vmem [shape: f32[1,128], index: 2, kind: input, shape index: {}]   ;;  %s671_s3 = inlined_call_operand.hbm [shape: f32[16,128], index: 3, kind: output, shape index: {}]  }
   0x1   :  { %9 = vsyncpa [#allocation6], 0 }
   0x2   :  { %10 = vsyncpa [#allocation4], 0  ;;  %s525_s12 = smov [#allocation2]   ;;  %s453_s16 = scalar_lea.hbm %s668_s0, 256 }
   0x3   :  { %s16_s13 = sshll.u32 %s525_s12, 4  ;;  %p454_p0 = scmp.ne.s32.totalorder %s668_s0, %s453_s16  ;;  %s17_s13 = int_to_ptr.vmem [resolvable:$true] %s16_s13 }
   0x4   :  { %p457_p1 = scmp.lt.u32.totalorder %s453_s16, %s668_s0 }
   0x6   :  { %p459_p2 = pnand %p457_p1, %p454_p0 }
   0x8   :  { %462 = shalt.err (!%p459_p2)
}
   0x9   :  { %s463_s21 = scalar_lea.vmem %s17_s13, 256  ;;  %p468_p4 = scmp.lt.s32.totalorder %s17_s13, %s17_s13 }
   0xa   :  { %p464_p3 = scmp.ne.s32.totalorder %s17_s13, %s463_s21  ;;  %p469_p5 = scmp.lt.s32.totalorder %s463_s21, %s463_s21 }
   0xc   :  { %p470_p6 = por %p469_p5, %p468_p4 }
   0xe   :  { %p471_p7 = pnand %p470_p6, %p464_p3 }
  0x10   :  { %474 = shalt.err (!%p471_p7)
}
  0x11   :  { %s526_s22 = smov 128   ;;  %s527_s23 = smov 8  }
  0x12   :  { %22 = dma.hbm_to_vmem [thread:$0]  %s668_s0, 256, %s17_s13, [#allocation3], %s526_s22, %s526_s22, %s527_s23  }
  0x13   :  { %s528_s26 = smov [#allocation5]   ;;  %s475_s30 = scalar_lea.hbm %s669_s1, 1024 }
  0x14   :  { %s28_s27 = sshll.u32 %s528_s26, 4  ;;  %p476_p8 = scmp.ne.s32.totalorder %s669_s1, %s475_s30  ;;  %s29_s27 = int_to_ptr.vmem [resolvable:$true] %s28_s27 }
  0x15   :  { %p479_p9 = scmp.lt.u32.totalorder %s475_s30, %s669_s1 }
  0x17   :  { %p481_p10 = pnand %p479_p9, %p476_p8 }
  0x19   :  { %484 = shalt.err (!%p481_p10)
}
  0x1a   :  { %s485_s8 = scalar_lea.vmem %s29_s27, 1024  ;;  %p490_p12 = scmp.lt.s32.totalorder %s29_s27, %s29_s27 }
  0x1b   :  { %p486_p11 = scmp.ne.s32.totalorder %s29_s27, %s485_s8  ;;  %p491_p13 = scmp.lt.s32.totalorder %s485_s8, %s485_s8 }
  0x1d   :  { %p492_p0 = por %p491_p13, %p490_p12 }
  0x1f   :  { %p493_p1 = pnand %p492_p0, %p486_p11 }
  0x21   :  { %496 = shalt.err (!%p493_p1)
}
  0x22   :  { %34 = dma.hbm_to_vmem [thread:$0]  %s669_s1, 1024, %s29_s27, [#allocation6], %s526_s22, %s526_s22, %s527_s23  }
  0x23   :  { %519 = dma.done.wait [#allocation3], 256  }
  0x24   :  { %520 = vsyncadd [#allocation3], 4294967040 }
  0x25   :  { %521 = dma.done.wait [#allocation6], 1024  }
  0x26   :  { %522 = vsyncadd [#allocation6], 4294966272  ;;  %v45_v0 = vld [vmem:[#allocation5] sm:$0xff]  ;;  %v46_v1 = vld [vmem:[#allocation5 + $0x8] sm:$0xff]  ;;  %vm60_vm0 = vcmask 523264  }
  0x27   :  { %v47_v2 = vld [vmem:[#allocation5 + $0x10] sm:$0xff]  ;;  %v410_v3 = vpack.c.bf16 %v46_v1, %v45_v0  ;;  %v48_v4 = vld [vmem:[#allocation5 + $0x18] sm:$0xff]  ;;  %v49_v6 = vld [vmem:[#allocation5 + $0x20] sm:$0xff]  ;;  %v529_v39 = vmov 683565275  }
  0x28   :  { %v414_v5 = vpack.c.bf16 %v48_v4, %v47_v2  ;;  %v50_v7 = vld [vmem:[#allocation5 + $0x28] sm:$0xff]  ;;  %v43_v8 = vld [vmem:[#allocation2] sm:$0xff]  ;;  %v52_v11 = vld [vmem:[#allocation5 + $0x38] sm:$0xff]  ;;  %v530_v43 = vmov 2475754826  }
  0x29   :  { %411 = vmatprep.subr.bf16.mxu0 %v410_v3  ;;  %407 = vmatprep.mubr.msk.f32.mxu0 %vm60_vm0, %v43_v8  ;;  %v418_v9 = vpack.c.bf16 %v50_v7, %v49_v6  ;;  %v51_v10 = vld [vmem:[#allocation5 + $0x30] sm:$0xff]  ;;  %v44_v13 = vld [vmem:[#allocation2 + $0x8] sm:$0xff]  ;;  %v531_v45 = vmov 2131351028   ;;  %v532_v47 = vmov 2102212464  }
  0x2a   :  { %413 = vmatpush3.bf16.msra.mxu0 %v410_v3  ;;  %v422_v12 = vpack.c.bf16 %v52_v11, %v51_v10  ;;  %v370_v14 = vld [vmem:[%s670_s2] ss:$0 sm:$0xff]  ;;  %v533_v49 = vmov 920167782   ;;  %v534_v56 = vmov 1326507024  }
  0x2b   :  { %415 = vmatprep.subr.bf16.mxu0 %v414_v5  ;;  %s535_s2 = smov [#allocation7]  }
  0x2c   :  { %s357_s11 = sshll.u32 %s535_s2, 4  ;;  %s358_s11 = int_to_ptr.vmem [resolvable:$true] %s357_s11 }
  0x2d   :  { %s497_s12 = scalar_lea.vmem %s358_s11, 256  ;;  %p502_p3 = scmp.lt.s32.totalorder %s358_s11, %s358_s11 }
  0x2e   :  { %417 = vmatpush3.bf16.msra.mxu0 %v414_v5  ;;  %p498_p2 = scmp.ne.s32.totalorder %s358_s11, %s497_s12  ;;  %p503_p4 = scmp.lt.s32.totalorder %s497_s12, %s497_s12 }
  0x2f   :  { %419 = vmatprep.subr.bf16.mxu0 %v418_v9 }
  0x30   :  { %p504_p5 = por %p503_p4, %p502_p3 }
  0x32   :  { %421 = vmatpush3.bf16.msra.mxu0 %v418_v9  ;;  %p505_p6 = pnand %p504_p5, %p498_p2 }
  0x33   :  { %423 = vmatprep.subr.bf16.mxu0 %v422_v12 }
  0x36   :  { %425 = vmatpush3.bf16.msra.mxu0 %v422_v12 }
  0x39   :  { %408 = vmatmul.mubr.msk.f32.vlgmr.msra.gmra.mrb[0].mxu0 %vm60_vm0, %v44_v13 }
 0x10c   :  { %v409_v15 = vpop.f32.mrb[0].mxu0 }
 0x10d   :  { %v591_v16 = vadd.f32 %v409_v15, %v370_v14  ;;  %v133_v17 = vpop.f32.mrb[1].mxu0 }
 0x10e   :  { %v593_v18 = vadd.f32 %v370_v14, %v133_v17 }
 0x10f   :  { %v246_v19 = vand.u32 2147483647, %v591_v16  ;;  %v249_v20 = vand.u32 2139095040, %v591_v16  ;;  %vm248_vm15 = vcmp.lt.s32.totalorder %v591_v16, 0 }
 0x110   :  { %v145_v21 = vand.u32 2139095040, %v593_v18  ;;  %v142_v24 = vand.u32 2147483647, %v593_v18 }
 0x111   :  { %v250_v22 = vshrl.u32 %v249_v20, 23  ;;  %v253_v23 = vand.u32 8388607, %v246_v19  ;;  %vm247_vm0 = vcmp.le.f32.partialorder %v246_v19, 0.7853982 }
 0x112   :  { %v146_v25 = vshrl.u32 %v145_v21, 23  ;;  %v603_v30 = vand.u32 8388607, %v142_v24 }
 0x113   :  { %v377_v26 = vadd.s32 4294967169, %v250_v22  ;;  %v254_v29 = vor.u32 8388608, %v253_v23 }
 0x114   :  { %v373_v27 = vadd.s32 4294967169, %v146_v25  ;;  %v150_v37 = vor.u32 8388608, %v603_v30 }
 0x115   :  { %v256_v28 = vadd.s32 1, %v377_v26  ;;  %v605_v36 = vshll.u32 %v254_v29, 8 }
 0x116   :  { %v152_v31 = vadd.s32 1, %v373_v27 }
 0x117   :  { %vm257_vm1 = vcmp.gt.s32.totalorder %v256_v28, 0 }
 0x118   :  { %v258_v32 = vsel %vm257_vm1, %v256_v28, 0  ;;  %vm153_vm2 = vcmp.gt.s32.totalorder %v152_v31, 0  ;;  %vm144_vm1 = vcmp.lt.s32.totalorder %v593_v18, 0 }
 0x119   :  { %v259_v33 = vshrl.u32 %v258_v32, 5  ;;  %v260_v34 = vand.u32 31, %v258_v32  ;;  %v154_v35 = vsel %vm153_vm2, %v152_v31, 0  ;;  %v190_v31 = vshll.u32 %v150_v37, 8 }
 0x11a   :  { %v608_v41 = vshrl.u32 %v154_v35, 5  ;;  %v156_v42 = vand.u32 31, %v154_v35  ;;  %vm143_vm2 = vcmp.le.f32.partialorder %v142_v24, 0.7853982 }
 0x11b   :  { %v261_v38 = vsub.s32 32, %v260_v34  ;;  %v263_v40 = vshll.u32 %v529_v39, %v260_v34  ;;  %v266_v44 = vshll.u32 %v530_v43, %v260_v34  ;;  %v269_v46 = vshll.u32 %v531_v45, %v260_v34 }
 0x11c   :  { %v272_v48 = vshll.u32 %v532_v47, %v260_v34  ;;  %v275_v50 = vshll.u32 %v533_v49, %v260_v34  ;;  %vm278_vm3 = vcmp.lt.s32.totalorder %v259_v33, 1  ;;  %vm279_vm4 = vcmp.lt.s32.totalorder %v259_v33, 2 }
 0x11d   :  { %v264_v51 = vshrl.u32 %v530_v43, %v261_v38  ;;  %v267_v52 = vshrl.u32 %v531_v45, %v261_v38  ;;  %v270_v53 = vshrl.u32 %v532_v47, %v261_v38  ;;  %v262_v54 = vshrl.u32 %v529_v39, %v261_v38 }
 0x11e   :  { %v273_v55 = vshrl.u32 %v533_v49, %v261_v38  ;;  %v276_v57 = vshrl.u32 %v534_v56, %v261_v38  ;;  %v157_v61 = vsub.s32 32, %v156_v42  ;;  %vm280_vm5 = vcmp.lt.s32.totalorder %v259_v33, 3 }
 0x11f   :  { %v265_v58 = vor.u32 %v264_v51, %v263_v40  ;;  %v268_v59 = vor.u32 %v267_v52, %v266_v44  ;;  %v271_v60 = vor.u32 %v270_v53, %v269_v46  ;;  %vm281_vm6 = vcmp.lt.s32.totalorder %v259_v33, 4 }
 0x120   :  { %v274_v62 = vor.u32 %v273_v55, %v272_v48  ;;  %v277_v63 = vor.u32 %v276_v57, %v275_v50  ;;  %v159_v7 = vshll.u32 %v529_v39, %v156_v42  ;;  %v160_v10 = vshrl.u32 %v530_v43, %v157_v61 }
 0x121   :  { %v282_v0 = vsel %vm278_vm3, %v262_v54, %v265_v58  ;;  %v283_v1 = vsel %vm281_vm6, %v271_v60, 2102212464  ;;  %v286_v2 = vsel %vm278_vm3, %v265_v58, %v268_v59  ;;  %v290_v3 = vsel %vm278_vm3, %v268_v59, %v271_v60 }
 0x122   :  { %v284_v4 = vsel %vm280_vm5, %v268_v59, %v283_v1  ;;  %v287_v5 = vsel %vm281_vm6, %v274_v62, 920167782  ;;  %v291_v6 = vsel %vm281_vm6, %v277_v63, 1326507024  ;;  %v162_v11 = vshll.u32 %v530_v43, %v156_v42 }
 0x123   :  { %v288_v8 = vsel %vm280_vm5, %v271_v60, %v287_v5  ;;  %v292_v9 = vsel %vm280_vm5, %v274_v62, %v291_v6  ;;  %v285_v12 = vsel %vm279_vm4, %v282_v0, %v284_v4  ;;  %v163_v15 = vshrl.u32 %v531_v45, %v157_v61 }
 0x124   :  { %v289_v13 = vsel %vm279_vm4, %v286_v2, %v288_v8  ;;  %v293_v14 = vsel %vm279_vm4, %v290_v3, %v292_v9  ;;  %v161_v23 = vor.u32 %v160_v10, %v159_v7  ;;  %v165_v26 = vshll.u32 %v531_v45, %v156_v42 }
 0x125   :  { %v617_v17 = vmul.u32.u64.low %v605_v36, %v293_v14  ;;  %v618_v20 = vmul.u32.u64.high %v605_v36, %v293_v14, %v617_v17  ;;  %v621_v21 = vmul.u32.u64.low %v605_v36, %v289_v13  ;;  %v622_v22 = vmul.u32.u64.high %v605_v36, %v289_v13, %v621_v21 }
 0x126   :  { %v164_v25 = vor.u32 %v163_v15, %v162_v11  ;;  %v166_v27 = vshrl.u32 %v532_v47, %v157_v61  ;;  %v168_v28 = vshll.u32 %v532_v47, %v156_v42  ;;  %v169_v29 = vshrl.u32 %v533_v49, %v157_v61 }
 0x127   :  { %v172_v30 = vshrl.u32 %v534_v56, %v157_v61  ;;  %v301_v32 = vmul.u32 %v605_v36, %v285_v12  ;;  %v158_v33 = vshrl.u32 %v529_v39, %v157_v61  ;;  %v171_v35 = vshll.u32 %v533_v49, %v156_v42 }
 0x128   :  { %v167_v34 = vor.u32 %v166_v27, %v165_v26  ;;  %vm303_vm7 = vc.u32 %v618_v20, %v621_v21  ;;  %v304_v38 = vadd.s32 1, %v622_v22  ;;  %v170_v40 = vor.u32 %v169_v29, %v168_v28 }
 0x129   :  { %vm174_vm8 = vcmp.lt.s32.totalorder %v608_v41, 1  ;;  %v173_v43 = vor.u32 %v172_v30, %v171_v35  ;;  %vm176_vm9 = vcmp.lt.s32.totalorder %v608_v41, 3  ;;  %vm177_vm10 = vcmp.lt.s32.totalorder %v608_v41, 4 }
 0x12a   :  { %v182_v44 = vsel %vm174_vm8, %v161_v23, %v164_v25  ;;  %v305_v37 = vsel %vm303_vm7, %v304_v38, %v622_v22  ;;  %v179_v45 = vsel %vm177_vm10, %v167_v34, 2102212464  ;;  %v183_v36 = vsel %vm177_vm10, %v170_v40, 920167782 }
 0x12b   :  { %v186_v39 = vsel %vm174_vm8, %v164_v25, %v167_v34  ;;  %v306_v46 = vadd.s32 %v305_v37, %v301_v32  ;;  %vm175_vm11 = vcmp.lt.s32.totalorder %v608_v41, 2  ;;  %v184_v42 = vsel %vm176_vm9, %v167_v34, %v183_v36 }
 0x12c   :  { %v187_v47 = vsel %vm177_vm10, %v173_v43, 1326507024  ;;  %v178_v48 = vsel %vm174_vm8, %v158_v33, %v161_v23  ;;  %v180_v49 = vsel %vm176_vm9, %v164_v25, %v179_v45  ;;  %v185_v50 = vsel %vm175_vm11, %v182_v44, %v184_v42 }
 0x12d   :  { %v188_v51 = vsel %vm176_vm9, %v170_v40, %v187_v47  ;;  %v307_v52 = vadd.s32 536870912, %v306_v46  ;;  %v632_v54 = vmul.u32.u64.low %v190_v31, %v185_v50  ;;  %v633_v55 = vmul.u32.u64.high %v190_v31, %v185_v50, %v632_v54 }
 0x12e   :  { %v189_v53 = vsel %vm175_vm11, %v186_v39, %v188_v51  ;;  %v181_v59 = vsel %vm175_vm11, %v178_v48, %v180_v49  ;;  %v302_v11 = vadd.s32 %v621_v21, %v618_v20  ;;  %vm338_vm6 = vweird.f32 %v591_v16 }
 0x12f   :  { %v635_v56 = vmul.u32.u64.low %v190_v31, %v189_v53  ;;  %v636_v57 = vmul.u32.u64.high %v190_v31, %v189_v53, %v635_v56  ;;  %v308_v58 = vshrl.u32 %v307_v52, 30  ;;  %v200_v61 = vadd.s32 1, %v633_v55 }
 0x130   :  { %v197_v41 = vmul.u32 %v190_v31, %v181_v59  ;;  %vm234_vm10 = vweird.f32 %v593_v18 }
 0x131   :  { %v309_v60 = vshll.u32 %v308_v58, 30  ;;  %vm199_vm12 = vc.u32 %v636_v57, %v632_v54  ;;  %v198_v32 = vadd.s32 %v632_v54, %v636_v57  ;;  %v332_v21 = vsub.s32 4, %v308_v58 }
 0x132   :  { %v201_v63 = vsel %vm199_vm12, %v200_v61, %v633_v55 }
 0x133   :  { %v310_v62 = vsub.s32 %v306_v46, %v309_v60  ;;  %v202_v0 = vadd.s32 %v201_v63, %v197_v41  ;;  %v333_v36 = vsel %vm248_vm15, %v332_v21, %v308_v58 }
 0x134   :  { %v335_v48 = vsel %vm247_vm0, 0, %v333_v36 }
 0x135   :  { %v312_v1 = vsub.s32 0, %v310_v62  ;;  %v203_v2 = vadd.s32 536870912, %v202_v0  ;;  %v339_v51 = vadd.s32 3, %v335_v48 }
 0x137   :  { %v378_v3 = vmin.u32 %v312_v1, %v310_v62  ;;  %v204_v4 = vshrl.u32 %v203_v2, 30  ;;  %v340_v55 = vand.u32 3, %v339_v51 }
 0x139   :  { %v314_v5 = vclz %v378_v3  ;;  %v205_v6 = vshll.u32 %v204_v4, 30  ;;  %v228_v50 = vsub.s32 4, %v204_v4  ;;  %vm345_vm3 = vcmp.eq.s32.totalorder %v340_v55, 2 }
 0x13a   :  { %vm342_vm4 = vcmp.eq.s32.totalorder %v340_v55, 0  ;;  %vm341_vm5 = vcmp.lt.s32.totalorder %v340_v55, 2 }
 0x13b   :  { %v379_v7 = vadd.s32 4294967294, %v314_v5  ;;  %v206_v8 = vsub.s32 %v202_v0, %v205_v6  ;;  %v229_v53 = vsel %vm144_vm1, %v228_v50, %v204_v4 }
 0x13c   :  { %v231_v57 = vsel %vm143_vm2, 0, %v229_v53 }
 0x13d   :  { %vm380_vm13 = vcmp.lt.s32.totalorder %v379_v7, 0  ;;  %v208_v10 = vsub.s32 0, %v206_v8  ;;  %v235_v61 = vadd.s32 3, %v231_v57 }
 0x13e   :  { %v317_v9 = vsel %vm380_vm13, 0, %v379_v7 }
 0x13f   :  { %v318_v12 = vsub.s32 32, %v317_v9  ;;  %v322_v13 = vsub.s32 4294967266, %v317_v9  ;;  %v374_v14 = vmin.u32 %v208_v10, %v206_v8  ;;  %v319_v15 = vshll.u32 %v310_v62, %v317_v9 }
 0x140   :  { %v236_v0 = vand.u32 3, %v235_v61 }
 0x141   :  { %v320_v17 = vshrl.u32 %v302_v11, %v318_v12  ;;  %v323_v22 = vadd.s32 127, %v322_v13  ;;  %v210_v23 = vclz %v374_v14 }
 0x142   :  { %vm241_vm7 = vcmp.eq.s32.totalorder %v236_v0, 2  ;;  %vm238_vm8 = vcmp.eq.s32.totalorder %v236_v0, 0  ;;  %vm237_vm9 = vcmp.lt.s32.totalorder %v236_v0, 2 }
 0x143   :  { %v321_v25 = vor.u32 %v320_v17, %v319_v15  ;;  %v324_v26 = vshll.u32 %v323_v22, 23  ;;  %v375_v27 = vadd.s32 4294967294, %v210_v23 }
 0x145   :  { %v325_v28 = vor.u32 4788187, %v324_v26  ;;  %vm376_vm14 = vcmp.lt.s32.totalorder %v375_v27, 0  ;;  %v328_v30 = vcvt.s32.f32 %v321_v25 }
 0x146   :  { %v213_v31 = vsel %vm376_vm14, 0, %v375_v27 }
 0x147   :  { %v326_v29 = vand.u32 2147483647, %v325_v28  ;;  %v214_v33 = vsub.s32 32, %v213_v31  ;;  %v218_v34 = vsub.s32 4294967266, %v213_v31  ;;  %v215_v35 = vshll.u32 %v206_v8, %v213_v31 }
 0x149   :  { %v329_v20 = vmul.f32 %v328_v30, %v326_v29  ;;  %v216_v38 = vshrl.u32 %v198_v32, %v214_v33  ;;  %v219_v40 = vadd.s32 127, %v218_v34 }
 0x14b   :  { %v330_v43 = vxor.u32 2147483648, %v329_v20  ;;  %v217_v44 = vor.u32 %v216_v38, %v215_v35  ;;  %v220_v37 = vshll.u32 %v219_v40, 23 }
 0x14d   :  { %v331_v45 = vsel %vm248_vm15, %v330_v43, %v329_v20  ;;  %v221_v46 = vor.u32 4788187, %v220_v37  ;;  %v224_v47 = vcvt.s32.f32 %v217_v44 }
 0x14e   :  { %v334_v39 = vsel %vm247_vm0, %v591_v16, %v331_v45 }
 0x14f   :  { %445 = vcosq.f32 %v334_v39  ;;  %v222_v42 = vand.u32 2147483647, %v221_v46 }
 0x150   :  { %447 = vsinq.f32 %v334_v39 }
 0x151   :  { %v225_v49 = vmul.f32 %v224_v47, %v222_v42 }
 0x153   :  { %v226_v52 = vxor.u32 2147483648, %v225_v49 }
 0x155   :  { %v227_v19 = vsel %vm144_vm1, %v226_v52, %v225_v49 }
 0x156   :  { %v230_v54 = vsel %vm143_vm2, %v593_v18, %v227_v19 }
 0x157   :  { %449 = vcosq.f32 %v230_v54 }
 0x158   :  { %451 = vsinq.f32 %v230_v54 }
 0x159   :  { %v446_v56 = vpop.eup %445 }
 0x15a   :  { %v448_v58 = vpop.eup %447  ;;  %v346_v59 = vxor.u32 2147483648, %v446_v56 }
 0x15b   :  { %v343_v60 = vxor.u32 2147483648, %v448_v58 }
 0x15c   :  { %v347_v41 = vsel %vm345_vm3, %v346_v59, %v448_v58 }
 0x15d   :  { %v344_v62 = vsel %vm342_vm4, %v446_v56, %v343_v60 }
 0x15e   :  { %v348_v24 = vsel %vm341_vm5, %v344_v62, %v347_v41 }
 0x15f   :  { %v349_v63 = vsel %vm338_vm6, nan, %v348_v24 }
 0x160   :  { %351 = vst [vmem:[#allocation7 + $0x8] sm:$0xff] %v349_v63 }
 0x161   :  { %v450_v1 = vpop.eup %449 }
 0x162   :  { %v452_v2 = vpop.eup %451  ;;  %v242_v3 = vxor.u32 2147483648, %v450_v1 }
 0x163   :  { %v239_v4 = vxor.u32 2147483648, %v452_v2 }
 0x164   :  { %v243_v5 = vsel %vm241_vm7, %v242_v3, %v452_v2 }
 0x165   :  { %v240_v6 = vsel %vm238_vm8, %v450_v1, %v239_v4 }
 0x166   :  { %v244_v7 = vsel %vm237_vm9, %v240_v6, %v243_v5 }
 0x167   :  { %v245_v16 = vsel %vm234_vm10, nan, %v244_v7 }
 0x168   :  { %350 = vst [vmem:[#allocation7] sm:$0xff] %v245_v16 }
 0x169   :  { %508 = shalt.err (!%p505_p6)
}
 0x16a   :  { %s509_s15 = scalar_lea.hbm %s671_s3, 256 }
 0x16b   :  { %p510_p7 = scmp.ne.s32.totalorder %s671_s3, %s509_s15  ;;  %p513_p8 = scmp.lt.u32.totalorder %s509_s15, %s671_s3 }
 0x16d   :  { %p515_p9 = pnand %p513_p8, %p510_p7 }
 0x16f   :  { %518 = shalt.err (!%p515_p9)
}
 0x170   :  { %363 = dma.vmem_to_hbm [thread:$0]  %s358_s11, 256, %s671_s3, [#allocation4], %s526_s22, %s526_s22, %s527_s23  }
 0x171   :  { %523 = dma.done.wait [#allocation4], 256  }
 0x172   :  { %524 = vsyncadd [#allocation4], 4294967040 }
 0x173   :  { %367 = vsyncpa [#allocation3], 1 }
 0x174   :  { %368 = vsyncpa [#allocation6], 1 }
 0x175   :  { %369 = vsyncpa [#allocation4], 1 }

</bundles_post_ra>
